<compile_context>
chip_gen: v5e
topology: v5e:2x2
jax: 0.10.0
libtpu: 0.0.40
codegen_flags: <defaults>
</compile_context>

<pallas_src>
import functools
import math

import jax
import jax.numpy as jnp
from jax.experimental import pallas as pl
from jax.experimental.pallas import tpu as pltpu


def _round_up(x, m):
    return ((x + m - 1) // m) * m


def _vmem_limit(nbytes):
    # 2x headroom + 4 MiB slack, clamped to [16 MiB, 48 MiB] (v7x physical = 64 MiB).
    return int(min(max(2 * nbytes + (4 << 20), 16 << 20), 48 << 20))


# ---------------------------------------------------------------------------
# Kernel 1: fully fused forward for small graphs (whole arrays in VMEM, no grid)
#   out = adj @ (relu(adj @ (x @ W1) + b1) @ W2) + b2
# ---------------------------------------------------------------------------
def _gcn_fused_kernel(adj_ref, x_ref, w1_ref, b1_ref, w2_ref, b2_ref, o_ref):
    adj = adj_ref[...]                                      # bf16 [N, N], loaded once

    # layer 1: h = relu(adj @ (x @ W1) + b1); s1 stays f32, downcast only for MXU.
    s1 = jnp.dot(x_ref[...], w1_ref[...], preferred_element_type=jnp.float32)
    h = jnp.dot(adj, s1.astype(jnp.bfloat16), preferred_element_type=jnp.float32)
    h = jnp.maximum(h + b1_ref[...], 0.0)                   # bias (1, Hp) broadcasts

    # F.dropout(p=0.5, training=False) == identity (eval mode).
    # layer 2: out = adj @ (h @ W2) + b2
    s2 = jnp.dot(h.astype(jnp.bfloat16), w2_ref[...], preferred_element_type=jnp.float32)
    out = jnp.dot(adj, s2.astype(jnp.bfloat16), preferred_element_type=jnp.float32)
    o_ref[...] = (out + b2_ref[...]).astype(o_ref.dtype)


# ---------------------------------------------------------------------------
# Kernel 2 (tiled path): row-tiled s = x @ W  (W resident / full-extent)
# ---------------------------------------------------------------------------
def _xw_kernel(x_ref, w_ref, o_ref):
    o_ref[...] = jnp.dot(
        x_ref[...], w_ref[...], preferred_element_type=jnp.float32
    ).astype(o_ref.dtype)


def _xw_call(x_p, w_p, *, tile_m, out_dtype):
    n_m, f_p = x_p.shape
    h_p = w_p.shape[1]
    nbytes = (2 * tile_m * f_p * x_p.dtype.itemsize          # double-buffered x tile
              + 2 * f_p * h_p * w_p.dtype.itemsize           # resident W
              + 2 * tile_m * h_p * jnp.dtype(out_dtype).itemsize)
    return pl.pallas_call(
        _xw_kernel,
        out_shape=jax.ShapeDtypeStruct((n_m, h_p), out_dtype),
        grid_spec=pltpu.PrefetchScalarGridSpec(
            num_scalar_prefetch=0,
            grid=(n_m // tile_m,),
            in_specs=[
                pl.BlockSpec((tile_m, f_p), lambda i: (i, 0)),
                pl.BlockSpec((f_p, h_p), lambda i: (0, 0)),   # W resident
            ],
            out_specs=pl.BlockSpec((tile_m, h_p), lambda i: (i, 0)),
        ),
        compiler_params=pltpu.CompilerParams(
            dimension_semantics=("parallel",),
            vmem_limit_bytes=_vmem_limit(nbytes),
        ),
    )(x_p, w_p)


# ---------------------------------------------------------------------------
# Kernel 3 (tiled path): out = [relu](adj @ s + b), adj streamed block-wise,
# s resident (full-extent BlockSpec), f32 VMEM accumulator, reduction axis last.
# ---------------------------------------------------------------------------
def _adj_agg_kernel(adj_ref, s_ref, b_ref, o_ref, acc_ref, *, relu):
    k = pl.program_id(1)

    @pl.when(k == 0)
    def _init():
        acc_ref[...] = jnp.zeros_like(acc_ref)

    tk = adj_ref.shape[1]
    start = pl.multiple_of(k * tk, tk)
    s_blk = s_ref[pl.ds(start, tk), :]                       # slice of resident s
    acc_ref[...] += jnp.dot(adj_ref[...], s_blk, preferred_element_type=jnp.float32)

    @pl.when(k == pl.num_programs(1) - 1)
    def _finalize():
        out = acc_ref[...] + b_ref[...]
        if relu:
            out = jnp.maximum(out, 0.0)
        o_ref[...] = out.astype(o_ref.dtype)


def _adj_agg_call(adj_p, s_p, b_p, *, relu, out_dtype, tile_m, tile_k):
    n_m, n_k = adj_p.shape
    h_p = s_p.shape[1]
    nbytes = (2 * tile_m * tile_k * adj_p.dtype.itemsize      # double-buffered adj tile
              + 2 * n_k * h_p * s_p.dtype.itemsize            # resident s (+ spare)
              + tile_m * h_p * 4                              # f32 accumulator
              + 2 * tile_m * h_p * jnp.dtype(out_dtype).itemsize
              + 2 * h_p * 4)                                  # bias
    return pl.pallas_call(
        functools.partial(_adj_agg_kernel, relu=relu),
        out_shape=jax.ShapeDtypeStruct((n_m, h_p), out_dtype),
        grid_spec=pltpu.PrefetchScalarGridSpec(
            num_scalar_prefetch=0,
            grid=(n_m // tile_m, n_k // tile_k),
            in_specs=[
                pl.BlockSpec((tile_m, tile_k), lambda i, k: (i, k)),  # adj streamed
                pl.BlockSpec((n_k, h_p), lambda i, k: (0, 0)),        # s resident
                pl.BlockSpec((1, h_p), lambda i, k: (0, 0)),          # bias resident
            ],
            out_specs=pl.BlockSpec((tile_m, h_p), lambda i, k: (i, 0)),
            scratch_shapes=[pltpu.VMEM((tile_m, h_p), jnp.float32)],
        ),
        compiler_params=pltpu.CompilerParams(
            dimension_semantics=("parallel", "arbitrary"),   # rows shard across v7x TCs
            vmem_limit_bytes=_vmem_limit(nbytes),
        ),
    )(adj_p, s_p, b_p)


# ---------------------------------------------------------------------------
# Forward-pass factory: pads / casts graph constants ONCE, returns jitted fwd(x)
# ---------------------------------------------------------------------------
def make_gcn_forward(adj_norm, params, *, node_limit_fused=1024, tile_m=512, tile_k=512):
    (w1, b1), (w2, b2) = params
    n = adj_norm.shape[0]
    f_in, h_dim = w1.shape
    c_dim = w2.shape[1]

    f_p = _round_up(f_in, 128)
    h_p = _round_up(h_dim, 128)
    c_p = _round_up(c_dim, 128)

    bf16 = jnp.bfloat16
    # NOTE: zero padding is load-bearing for correctness: padded adj rows/cols,
    # padded weight rows/cols and padded bias lanes must all be ZERO so padded
    # h rows/cols never leak into real output rows (they meet zero adj columns
    # and are sliced off outside the kernel).
    w1_p = jnp.zeros((f_p, h_p), bf16).at[:f_in, :h_dim].set(w1.astype(bf16))
    w2_p = jnp.zeros((h_p, c_p), bf16).at[:h_dim, :c_dim].set(w2.astype(bf16))
    b1_p = jnp.zeros((1, h_p), jnp.float32).at[0, :h_dim].set(b1)
    b2_p = jnp.zeros((1, c_p), jnp.float32).at[0, :c_dim].set(b2)

    if n <= node_limit_fused:
        # ----- small-graph path: one fused kernel, no grid, no N padding -----
        adj_p = adj_norm.astype(bf16)
        nbytes = (2 * (n * n + n * f_p + f_p * h_p + h_p * c_p)    # bf16 inputs
                  + 4 * (h_p + c_p + n * c_p)                      # f32 biases + out
                  + 8 * (n * h_p + n * c_p))                       # f32 temporaries
        vmem_limit = _vmem_limit(nbytes)

        def forward(x):
            x_p = jnp.zeros((n, f_p), bf16).at[:, :f_in].set(x.astype(bf16))
            out_p = pl.pallas_call(
                _gcn_fused_kernel,
                out_shape=jax.ShapeDtypeStruct((n, c_p), jnp.float32),
                compiler_params=pltpu.CompilerParams(vmem_limit_bytes=vmem_limit),
            )(adj_p, x_p, w1_p, b1_p, w2_p, b2_p)
            return out_p[:, :c_dim]

    else:
        # ----- large-graph path: two tiled passes per layer -----
        tile_m = min(tile_m, _round_up(n, 128))
        tile_k = min(tile_k, _round_up(n, 128))
        n_pad = _round_up(_round_up(n, tile_m), tile_k)
        adj_p = jnp.zeros((n_pad, n_pad), bf16).at[:n, :n].set(adj_norm.astype(bf16))

        def forward(x):
            x_p = jnp.zeros((n_pad, f_p), bf16).at[:n, :f_in].set(x.astype(bf16))
            s1 = _xw_call(x_p, w1_p, tile_m=tile_m, out_dtype=bf16)
            h = _adj_agg_call(adj_p, s1, b1_p, relu=True, out_dtype=bf16,
                              tile_m=tile_m, tile_k=tile_k)
            # dropout(p=0.5, training=False) == identity
            s2 = _xw_call(h, w2_p, tile_m=tile_m, out_dtype=bf16)
            out_p = _adj_agg_call(adj_p, s2, b2_p, relu=False, out_dtype=jnp.float32,
                                  tile_m=tile_m, tile_k=tile_k)
            return out_p[:n, :c_dim]

    return jax.jit(forward)


# ---------------------------------------------------------------------------
# Glue: normalized adjacency + parameter init (plain JAX, matches the PyTorch ref)
# ---------------------------------------------------------------------------
def normalized_adj(adj):
    """adj_hat = D^{-1/2} (I + adj) D^{-1/2}, dense version of the sparse ref."""
    n = adj.shape[0]
    a = adj + jnp.eye(n, dtype=adj.dtype)
    deg = jnp.sum(a, axis=1)
    d_inv_sqrt = jnp.where(deg > 0, jax.lax.rsqrt(deg), 0.0)
    return (d_inv_sqrt[:, None] * a) * d_inv_sqrt[None, :]


def init_graph_conv(key, in_feats, out_feats):
    """Matches GraphConvolution.reset_parameters: U(-stdv, stdv), stdv=1/sqrt(out)."""
    stdv = 1.0 / math.sqrt(out_feats)
    k_w, k_b = jax.random.split(key)
    w = jax.random.uniform(k_w, (in_feats, out_feats), jnp.float32, -stdv, stdv)
    b = jax.random.uniform(k_b, (out_feats,), jnp.float32, -stdv, stdv)
    return w, b


def gcn_forward_ref(x, adj_norm, params):
    (w1, b1), (w2, b2) = params
    h = jnp.maximum(adj_norm @ (x @ w1) + b1, 0.0)
    return adj_norm @ (h @ w2) + b2


if __name__ == "__main__":
    key = jax.random.PRNGKey(0)
    k_adj, k_x, k_l1, k_l2, k_adj2, k_x2 = jax.random.split(key, 6)

    nfeats, nhids, nclasses = 32, 32, 8

    def make_graph(k, n):
        a = (jax.random.uniform(k, (n, n)) < 0.1).astype(jnp.float32)
        a = jnp.maximum(a, a.T) * (1.0 - jnp.eye(n, dtype=jnp.float32))
        return normalized_adj(a)

    params = (
        init_graph_conv(k_l1, nfeats, nhids),
        init_graph_conv(k_l2, nhids, nclasses),
    )

    # ---- small fused path (N = 64) ----
    n1 = 64
    adj1 = make_graph(k_adj, n1)
    x1 = jax.random.normal(k_x, (n1, nfeats), jnp.float32)
    fwd1 = make_gcn_forward(adj1, params)                   # fused, constants hoisted
    out1 = jax.block_until_ready(fwd1(x1))
    ref1 = gcn_forward_ref(x1, adj1, params)
    assert out1.shape == (n1, nclasses)
    assert jnp.allclose(out1, ref1, atol=5e-2, rtol=5e-2), (
        f"fused path max abs diff {float(jnp.max(jnp.abs(out1 - ref1)))}"
    )

    # ---- tiled large-graph path, forced at small size (N=192 -> pad 256, grid 2x2) ----
    n2 = 192
    adj2 = make_graph(k_adj2, n2)
    x2 = jax.random.normal(k_x2, (n2, nfeats), jnp.float32)
    fwd2 = make_gcn_forward(adj2, params, node_limit_fused=0, tile_m=128, tile_k=128)
    out2 = jax.block_until_ready(fwd2(x2))
    ref2 = gcn_forward_ref(x2, adj2, params)
    assert out2.shape == (n2, nclasses)
    assert jnp.allclose(out2, ref2, atol=5e-2, rtol=5e-2), (
        f"tiled path max abs diff {float(jnp.max(jnp.abs(out2 - ref2)))}"
    )

    print("KERNEL_OK")
</pallas_src>

<mosaic_0001>
module attributes {stable_mosaic.version = 11 : i64} {
  func.func @_gcn_fused_kernel(%arg0: memref<64x64xbf16, #tpu.memory_space<vmem>>, %arg1: memref<64x128xbf16, #tpu.memory_space<vmem>>, %arg2: memref<128x128xbf16, #tpu.memory_space<vmem>>, %arg3: memref<1x128xf32, #tpu.memory_space<vmem>>, %arg4: memref<128x128xbf16, #tpu.memory_space<vmem>>, %arg5: memref<1x128xf32, #tpu.memory_space<vmem>>, %arg6: memref<64x128xf32, #tpu.memory_space<vmem>>) attributes {dimension_semantics = [], scalar_prefetch = 0 : i64, scratch_operands = 0 : i64, tpu.core_type = #tpu.core_type<tc>} {
    %c0 = arith.constant 0 : index
    %c0_0 = arith.constant 0 : index
    %0 = vector.load %arg0[%c0, %c0_0] : memref<64x64xbf16, #tpu.memory_space<vmem>>, vector<64x64xbf16>
    %c0_1 = arith.constant 0 : index
    %c0_2 = arith.constant 0 : index
    %1 = vector.load %arg1[%c0_1, %c0_2] : memref<64x128xbf16, #tpu.memory_space<vmem>>, vector<64x128xbf16>
    %c0_3 = arith.constant 0 : index
    %c0_4 = arith.constant 0 : index
    %2 = vector.load %arg2[%c0_3, %c0_4] : memref<128x128xbf16, #tpu.memory_space<vmem>>, vector<128x128xbf16>
    %cst = arith.constant dense<0.000000e+00> : vector<64x128xf32>
    %3 = tpu.matmul %1, %2, %cst {dimension_numbers = #tpu.dot_dimension_numbers<[1], [0], [0], [1], [0, 0, 1, 1], [], []>} : vector<64x128xbf16>, vector<128x128xbf16>, vector<64x128xf32> -> vector<64x128xf32>
    %4 = arith.truncf %3 : vector<64x128xf32> to vector<64x128xbf16>
    %cst_5 = arith.constant dense<0.000000e+00> : vector<64x128xf32>
    %5 = tpu.matmul %0, %4, %cst_5 {dimension_numbers = #tpu.dot_dimension_numbers<[1], [0], [0], [1], [0, 0, 1, 1], [], []>} : vector<64x64xbf16>, vector<64x128xbf16>, vector<64x128xf32> -> vector<64x128xf32>
    %c0_6 = arith.constant 0 : index
    %c0_7 = arith.constant 0 : index
    %6 = vector.load %arg3[%c0_6, %c0_7] : memref<1x128xf32, #tpu.memory_space<vmem>>, vector<1x128xf32>
    %7 = vector.broadcast %6 : vector<1x128xf32> to vector<64x128xf32>
    %8 = arith.addf %5, %7 : vector<64x128xf32>
    %cst_8 = arith.constant 0.000000e+00 : f32
    %9 = vector.broadcast %cst_8 : f32 to vector<64x128xf32>
    %10 = arith.maximumf %8, %9 : vector<64x128xf32>
    %11 = arith.truncf %10 : vector<64x128xf32> to vector<64x128xbf16>
    %c0_9 = arith.constant 0 : index
    %c0_10 = arith.constant 0 : index
    %12 = vector.load %arg4[%c0_9, %c0_10] : memref<128x128xbf16, #tpu.memory_space<vmem>>, vector<128x128xbf16>
    %cst_11 = arith.constant dense<0.000000e+00> : vector<64x128xf32>
    %13 = tpu.matmul %11, %12, %cst_11 {dimension_numbers = #tpu.dot_dimension_numbers<[1], [0], [0], [1], [0, 0, 1, 1], [], []>} : vector<64x128xbf16>, vector<128x128xbf16>, vector<64x128xf32> -> vector<64x128xf32>
    %14 = arith.truncf %13 : vector<64x128xf32> to vector<64x128xbf16>
    %cst_12 = arith.constant dense<0.000000e+00> : vector<64x128xf32>
    %15 = tpu.matmul %0, %14, %cst_12 {dimension_numbers = #tpu.dot_dimension_numbers<[1], [0], [0], [1], [0, 0, 1, 1], [], []>} : vector<64x64xbf16>, vector<64x128xbf16>, vector<64x128xf32> -> vector<64x128xf32>
    %c0_13 = arith.constant 0 : index
    %c0_14 = arith.constant 0 : index
    %16 = vector.load %arg5[%c0_13, %c0_14] : memref<1x128xf32, #tpu.memory_space<vmem>>, vector<1x128xf32>
    %17 = vector.broadcast %16 : vector<1x128xf32> to vector<64x128xf32>
    %18 = arith.addf %15, %17 : vector<64x128xf32>
    %c0_15 = arith.constant 0 : index
    %c0_16 = arith.constant 0 : index
    %19 = vector.load %arg6[%c0_15, %c0_16] : memref<64x128xf32, #tpu.memory_space<vmem>>, vector<64x128xf32>
    tpu.vector_store %arg6[%c0_15, %c0_16], %18 {strides = array<i32>} : memref<64x128xf32, #tpu.memory_space<vmem>>, vector<64x128xf32>,
    return
  }
}

</mosaic_0001>

<bundles_post_ra>
// kernel: forward.1
= control target key start
LH: loop header
LB: loop body
LE: loop exit
PB: predicated region body
PF: predicated region fallthrough
CT: control target
= control target key end

     0   :  { %vm185_vm0 = vcmask 523264   ;;  %s672_s2 = inlined_call_operand.vmem [shape: bf16[128,128], index: 2, kind: input, shape index: {}]   ;;  %s673_s1 = inlined_call_operand.vmem [shape: bf16[64,128], index: 1, kind: input, shape index: {}]   ;;  %s674_s3 = inlined_call_operand.vmem [shape: f32[1,128], index: 3, kind: input, shape index: {}]   ;;  %s675_s0 = inlined_call_operand.vmem [shape: bf16[64,64], index: 0, kind: input, shape index: {}]   ;;  %s676_s4 = inlined_call_operand.vmem [shape: bf16[128,128], index: 4, kind: input, shape index: {}]   ;;  %s677_s5 = inlined_call_operand.vmem [shape: f32[1,128], index: 5, kind: input, shape index: {}]   ;;  %s678_s6 = inlined_call_operand.vmem [shape: f32[64,128], index: 6, kind: output, shape index: {}]  }
   0x1   :  { %v500_v0 = vld [vmem:[%s672_s2 + $0x38] sm:$0xff]  ;;  %v499_v1 = vld [vmem:[%s672_s2 + $0x30] sm:$0xff]  ;;  %v498_v2 = vld [vmem:[%s672_s2 + $0x28] sm:$0xff] }
   0x2   :  { %128 = vmatpush.bf16.msra.mxu0 %v500_v0  ;;  %v497_v3 = vld [vmem:[%s672_s2 + $0x20] sm:$0xff]  ;;  %v496_v4 = vld [vmem:[%s672_s2 + $0x18] sm:$0xff]  ;;  %v495_v5 = vld [vmem:[%s672_s2 + $0x10] sm:$0xff] }
   0x3   :  { %v494_v6 = vld [vmem:[%s672_s2 + $0x8] sm:$0xff]  ;;  %v493_v7 = vld [vmem:[%s672_s2] sm:$0xff]  ;;  %v491_v10 = vld [vmem:[%s673_s1 + $0x10] sm:$0xff] }
   0x4   :  { %v489_v8 = vld [vmem:[%s673_s1] sm:$0xff]  ;;  %v490_v9 = vld [vmem:[%s673_s1 + $0x8] sm:$0xff]  ;;  %v492_v11 = vld [vmem:[%s673_s1 + $0x18] sm:$0xff] }
   0x5   :  { %v585_v24 = vld [vmem:[%s675_s0] sm:$0xff]  ;;  %v592_v25 = vld [vmem:[%s675_s0 + $0x8] sm:$0xff]  ;;  %v508_v26 = vld [vmem:[%s676_s4 + $0x38] sm:$0xff] }
   0x6   :  { %129 = vmatpush.bf16.msra.mxu0 %v499_v1  ;;  %303 = vmatpush.bf16.msra.mxu2 %v508_v26  ;;  %v507_v27 = vld [vmem:[%s676_s4 + $0x30] sm:$0xff]  ;;  %v506_v28 = vld [vmem:[%s676_s4 + $0x28] sm:$0xff]  ;;  %v505_v29 = vld [vmem:[%s676_s4 + $0x20] sm:$0xff] }
   0x7   :  { %v611_v30 = vld [vmem:[%s675_s0 + $0x10] sm:$0xff]  ;;  %v618_v31 = vld [vmem:[%s675_s0 + $0x18] sm:$0xff]  ;;  %v502_v34 = vld [vmem:[%s676_s4 + $0x8] sm:$0xff] }
   0x8   :  { %v504_v32 = vld [vmem:[%s676_s4 + $0x18] sm:$0xff]  ;;  %v503_v33 = vld [vmem:[%s676_s4 + $0x10] sm:$0xff]  ;;  %v501_v35 = vld [vmem:[%s676_s4] sm:$0xff] }
   0x9   :  { %v509_v37 = vld [vmem:[%s674_s3] ss:$0 sm:$0xff] }
   0xa   :  { %130 = vmatpush.bf16.msra.mxu0 %v498_v2  ;;  %304 = vmatpush.bf16.msra.mxu2 %v507_v27 }
   0xe   :  { %131 = vmatpush.bf16.msra.mxu0 %v497_v3  ;;  %305 = vmatpush.bf16.msra.mxu2 %v506_v28 }
  0x12   :  { %132 = vmatpush.bf16.msra.mxu0 %v496_v4  ;;  %306 = vmatpush.bf16.msra.mxu2 %v505_v29 }
  0x16   :  { %133 = vmatpush.bf16.msra.mxu0 %v495_v5  ;;  %307 = vmatpush.bf16.msra.mxu2 %v504_v32 }
  0x1a   :  { %134 = vmatpush.bf16.msra.mxu0 %v494_v6  ;;  %308 = vmatpush.bf16.msra.mxu2 %v503_v33 }
  0x1e   :  { %135 = vmatpush.bf16.msra.mxu0 %v493_v7  ;;  %309 = vmatpush.bf16.msra.mxu2 %v502_v34 }
  0x21   :  { %136 = vmatmul.bf16.vlgmr.msra.gmra.mxu0 %v489_v8 }
  0x22   :  { %310 = vmatpush.bf16.msra.mxu2 %v501_v35 }
  0x31   :  { %141 = vmatmul.bf16.gmra.mxu0 %v490_v9 }
  0x41   :  { %146 = vmatmul.bf16.gmra.mxu0 %v491_v10 }
  0x51   :  { %151 = vmatmul.bf16.gmra.mxu0 %v492_v11 }
  0x9e   :  { %v137_v12 = vpop.f32.mrf.mxu0 }
  0xa6   :  { %v139_v13 = vpop.f32.mrf.mxu0 }
  0xa7   :  { %v157_v23 = vpack.c.bf16 %v139_v13, %v137_v12  ;;  %v510_v13 = vld [vmem:[%s677_s5] ss:$0 sm:$0xff] }
  0xae   :  { %v142_v14 = vpop.f32.mrf.mxu0 }
  0xb6   :  { %v144_v15 = vpop.f32.mrf.mxu0 }
  0xb7   :  { %v158_v22 = vpack.c.bf16 %v144_v15, %v142_v14 }
  0xbe   :  { %v147_v16 = vpop.f32.mrf.mxu0 }
  0xc6   :  { %v149_v17 = vpop.f32.mrf.mxu0 }
  0xc7   :  { %v159_v21 = vpack.c.bf16 %v149_v17, %v147_v16 }
  0xce   :  { %v152_v18 = vpop.f32.mrf.mxu0 }
  0xd6   :  { %v154_v19 = vpop.f32.mrf.mxu0 }
  0xd7   :  { %v160_v20 = vpack.c.bf16 %v154_v19, %v152_v18 }
  0xd9   :  { %202 = vmatpush.bf16.msra.mxu1 %v160_v20 }
  0xdd   :  { %203 = vmatpush.bf16.msra.mxu1 %v159_v21 }
  0xe1   :  { %204 = vmatpush.bf16.msra.mxu1 %v158_v22 }
  0xe5   :  { %205 = vmatpush.bf16.msra.mxu1 %v157_v23 }
  0xe8   :  { %445 = vmatmul.msk.bf16.vlgmr.msra.gmra.mxu1 %vm185_vm0, %v585_v24 }
  0xf8   :  { %446 = vmatmul.msk.bf16.gmra.mxu1 %vm185_vm0, %v592_v25 }
 0x108   :  { %447 = vmatmul.msk.bf16.gmra.mxu1 %vm185_vm0, %v611_v30 }
 0x118   :  { %448 = vmatmul.msk.bf16.gmra.mxu1 %vm185_vm0, %v618_v31 }
 0x165   :  { %v207_v36 = vpop.f32.mrf.mxu1 }
 0x166   :  { %v208_v38 = vadd.f32 %v509_v37, %v207_v36 }
 0x168   :  { %v227_v41 = vmax.f32 %v208_v38, 0.0 }
 0x16d   :  { %v209_v39 = vpop.f32.mrf.mxu1 }
 0x16e   :  { %v210_v40 = vadd.f32 %v509_v37, %v209_v39 }
 0x170   :  { %v228_v42 = vmax.f32 %v210_v40, 0.0 }
 0x172   :  { %v235_v43 = vpack.c.bf16 %v228_v42, %v227_v41 }
 0x174   :  { %311 = vmatmul.bf16.vlgmr.msra.gmra.mxu2 %v235_v43 }
 0x175   :  { %v212_v44 = vpop.f32.mrf.mxu1 }
 0x176   :  { %v213_v45 = vadd.f32 %v509_v37, %v212_v44 }
 0x178   :  { %v229_v48 = vmax.f32 %v213_v45, 0.0 }
 0x17d   :  { %v214_v46 = vpop.f32.mrf.mxu1 }
 0x17e   :  { %v215_v47 = vadd.f32 %v509_v37, %v214_v46 }
 0x180   :  { %v230_v49 = vmax.f32 %v215_v47, 0.0 }
 0x182   :  { %v236_v50 = vpack.c.bf16 %v230_v49, %v229_v48 }
 0x184   :  { %316 = vmatmul.bf16.gmra.mxu2 %v236_v50 }
 0x185   :  { %v217_v51 = vpop.f32.mrf.mxu1 }
 0x186   :  { %v218_v52 = vadd.f32 %v509_v37, %v217_v51 }
 0x188   :  { %v231_v55 = vmax.f32 %v218_v52, 0.0 }
 0x18d   :  { %v219_v53 = vpop.f32.mrf.mxu1 }
 0x18e   :  { %v220_v54 = vadd.f32 %v509_v37, %v219_v53 }
 0x190   :  { %v232_v56 = vmax.f32 %v220_v54, 0.0 }
 0x192   :  { %v237_v57 = vpack.c.bf16 %v232_v56, %v231_v55 }
 0x194   :  { %321 = vmatmul.bf16.gmra.mxu2 %v237_v57 }
 0x195   :  { %v222_v58 = vpop.f32.mrf.mxu1 }
 0x196   :  { %v223_v59 = vadd.f32 %v509_v37, %v222_v58 }
 0x198   :  { %v233_v62 = vmax.f32 %v223_v59, 0.0 }
 0x19d   :  { %v224_v60 = vpop.f32.mrf.mxu1 }
 0x19e   :  { %v225_v61 = vadd.f32 %v509_v37, %v224_v60 }
 0x1a0   :  { %v234_v63 = vmax.f32 %v225_v61, 0.0 }
 0x1a2   :  { %v238_v0 = vpack.c.bf16 %v234_v63, %v233_v62 }
 0x1a4   :  { %326 = vmatmul.bf16.gmra.mxu2 %v238_v0 }
 0x1f7   :  { %v312_v1 = vpop.f32.mrf.mxu2 }
 0x1ff   :  { %v314_v2 = vpop.f32.mrf.mxu2 }
 0x200   :  { %v332_v12 = vpack.c.bf16 %v314_v2, %v312_v1 }
 0x207   :  { %v317_v3 = vpop.f32.mrf.mxu2 }
 0x20f   :  { %v319_v4 = vpop.f32.mrf.mxu2 }
 0x210   :  { %v333_v11 = vpack.c.bf16 %v319_v4, %v317_v3 }
 0x217   :  { %v322_v5 = vpop.f32.mrf.mxu2 }
 0x21f   :  { %v324_v6 = vpop.f32.mrf.mxu2 }
 0x220   :  { %v334_v10 = vpack.c.bf16 %v324_v6, %v322_v5 }
 0x227   :  { %v327_v7 = vpop.f32.mrf.mxu2 }
 0x22f   :  { %v329_v8 = vpop.f32.mrf.mxu2 }
 0x230   :  { %v335_v9 = vpack.c.bf16 %v329_v8, %v327_v7 }
 0x232   :  { %344 = vmatpush.bf16.msra.mxu3 %v335_v9 }
 0x236   :  { %345 = vmatpush.bf16.msra.mxu3 %v334_v10 }
 0x23a   :  { %346 = vmatpush.bf16.msra.mxu3 %v333_v11 }
 0x23e   :  { %347 = vmatpush.bf16.msra.mxu3 %v332_v12 }
 0x241   :  { %481 = vmatmul.msk.bf16.vlgmr.msra.gmra.mxu3 %vm185_vm0, %v585_v24 }
 0x251   :  { %482 = vmatmul.msk.bf16.gmra.mxu3 %vm185_vm0, %v592_v25 }
 0x261   :  { %483 = vmatmul.msk.bf16.gmra.mxu3 %vm185_vm0, %v611_v30 }
 0x271   :  { %484 = vmatmul.msk.bf16.gmra.mxu3 %vm185_vm0, %v618_v31 }
 0x2c4   :  { %v349_v14 = vpop.f32.mrf.mxu3 }
 0x2c5   :  { %v350_v15 = vadd.f32 %v510_v13, %v349_v14 }
 0x2c7   :  { %369 = vst [vmem:[%s678_s6] sm:$0xff] %v350_v15 }
 0x2cc   :  { %v351_v16 = vpop.f32.mrf.mxu3 }
 0x2cd   :  { %v352_v17 = vadd.f32 %v510_v13, %v351_v16 }
 0x2cf   :  { %370 = vst [vmem:[%s678_s6 + $0x8] sm:$0xff] %v352_v17 }
 0x2d4   :  { %v354_v18 = vpop.f32.mrf.mxu3 }
 0x2d5   :  { %v355_v19 = vadd.f32 %v510_v13, %v354_v18 }
 0x2d7   :  { %371 = vst [vmem:[%s678_s6 + $0x10] sm:$0xff] %v355_v19 }
 0x2dc   :  { %v356_v20 = vpop.f32.mrf.mxu3 }
 0x2dd   :  { %v357_v21 = vadd.f32 %v510_v13, %v356_v20 }
 0x2df   :  { %372 = vst [vmem:[%s678_s6 + $0x18] sm:$0xff] %v357_v21 }
 0x2e4   :  { %v359_v22 = vpop.f32.mrf.mxu3 }
 0x2e5   :  { %v360_v23 = vadd.f32 %v510_v13, %v359_v22 }
 0x2e7   :  { %373 = vst [vmem:[%s678_s6 + $0x20] sm:$0xff] %v360_v23 }
 0x2ec   :  { %v361_v24 = vpop.f32.mrf.mxu3 }
 0x2ed   :  { %v362_v25 = vadd.f32 %v510_v13, %v361_v24 }
 0x2ef   :  { %374 = vst [vmem:[%s678_s6 + $0x28] sm:$0xff] %v362_v25 }
 0x2f4   :  { %v364_v26 = vpop.f32.mrf.mxu3 }
 0x2f5   :  { %v365_v27 = vadd.f32 %v510_v13, %v364_v26 }
 0x2f7   :  { %375 = vst [vmem:[%s678_s6 + $0x30] sm:$0xff] %v365_v27 }
 0x2fc   :  { %v366_v28 = vpop.f32.mrf.mxu3 }
 0x2fd   :  { %v367_v29 = vadd.f32 %v510_v13, %v366_v28 }
 0x2ff   :  { %376 = vst [vmem:[%s678_s6 + $0x38] sm:$0xff] %v367_v29 }

</bundles_post_ra>
